<compile_context>
chip_gen: v7x
topology: tpu7x:2x2x1
jax: 0.10.0
libtpu: 0.0.40
codegen_flags: <defaults>
</compile_context>

<pallas_src>
import math

import jax
import jax.numpy as jnp
from jax.experimental import pallas as pl
from jax.experimental.pallas import tpu as pltpu


def _attr_proj_kernel(x_ref, w_ref, b_ref, o_ref):
    # Single folded matmul on the MXU with f32 accumulation.
    z = jnp.dot(x_ref[...], w_ref[...], preferred_element_type=jnp.float32)
    z = z + b_ref[...]                       # (block_b, n_pad) + (1, n_pad)
    # Sigmoid: exp goes to the EUP, the divide/reciprocal is cheap vs. the matmul.
    out = 1.0 / (1.0 + jnp.exp(-z))
    o_ref[...] = out.astype(o_ref.dtype)


def attribute_projector_pallas(x, w0, b0, w1, b1, *, block_b=None):
    """x: (B, in_feat); w0: (in_feat, hidden); b0: (hidden,);
    w1: (hidden, out_dim=85); b1: (out_dim,).

    Weights are stored pre-transposed relative to PyTorch's (out, in) layout so
    the kernel does plain `x @ W` on the MXU.
    """
    B, in_feat = x.shape
    hidden = w0.shape[1]
    out_dim = w1.shape[1]

    # ---- Fold the two linear layers (done once, in plain JAX/XLA) ----------
    w0f = w0.astype(jnp.float32)
    w1f = w1.astype(jnp.float32)
    w_eff = jnp.dot(w0f, w1f)                                   # (in_feat, out_dim)
    b_eff = jnp.dot(b0.astype(jnp.float32).reshape(1, hidden), w1f) \
        + b1.astype(jnp.float32).reshape(1, out_dim)            # (1, out_dim)

    # ---- Pad output features to a multiple of 128 lanes --------------------
    n_pad = ((out_dim + 127) // 128) * 128
    if n_pad != out_dim:
        w_eff = jnp.pad(w_eff, ((0, 0), (0, n_pad - out_dim)))
        b_eff = jnp.pad(b_eff, ((0, 0), (0, n_pad - out_dim)))

    # ---- Batch tiling -------------------------------------------------------
    if block_b is None:
        # Cap the batch tile: keeps x/out tiles well inside the (smaller, 64 MiB)
        # v7x VMEM and gives >= 2 "parallel" grid steps for its 2 TensorCores
        # when the batch is large.  For small batches use the full batch
        # (full-dim exemption from the (8,128) rule).
        block_b = B if B <= 256 else 256
    if block_b < B:
        # Sublane alignment when tiling (f32 -> multiple of 8 rows).
        block_b = max(8, (block_b // 8) * 8)
    block_b = min(block_b, B)

    grid = (pl.cdiv(B, block_b),)

    out_padded = pl.pallas_call(
        _attr_proj_kernel,
        out_shape=jax.ShapeDtypeStruct((B, n_pad), x.dtype),
        grid_spec=pltpu.PrefetchScalarGridSpec(
            num_scalar_prefetch=0,
            grid=grid,
            in_specs=[
                pl.BlockSpec((block_b, in_feat), lambda i: (i, 0)),
                pl.BlockSpec((in_feat, n_pad), lambda i: (0, 0)),
                pl.BlockSpec((1, n_pad), lambda i: (0, 0)),
            ],
            out_specs=pl.BlockSpec((block_b, n_pad), lambda i: (i, 0)),
        ),
        compiler_params=pltpu.CompilerParams(
            dimension_semantics=("parallel",)),
    )(x, w_eff, b_eff)

    # Drop the padded lanes.
    return out_padded[:, :out_dim]


def init_params(key, in_feat, hidden_feat, out_dim=85, dtype=jnp.float32):
    """xavier_normal_ weights (PyTorch init_weights for Linear), zero biases.

    PyTorch nn.Linear weight shape is (out, in); we store the transpose (in, out).
    """
    k0, k1 = jax.random.split(key)
    std0 = math.sqrt(2.0 / (in_feat + hidden_feat))
    std1 = math.sqrt(2.0 / (hidden_feat + out_dim))
    w0 = (jax.random.normal(k0, (in_feat, hidden_feat)) * std0).astype(dtype)
    b0 = jnp.zeros((hidden_feat,), dtype)
    w1 = (jax.random.normal(k1, (hidden_feat, out_dim)) * std1).astype(dtype)
    b1 = jnp.zeros((out_dim,), dtype)
    return w0, b0, w1, b1


if __name__ == "__main__":
    # Small shapes consistent with the module: batch=8, in_feat=64,
    # hidden_feat=32, out_dim=85 (hard-coded in AttributeProjector).
    B, IN_FEAT, HIDDEN, OUT_DIM = 8, 64, 32, 85

    key = jax.random.PRNGKey(0)
    kx, kp = jax.random.split(key)
    x = jax.random.normal(kx, (B, IN_FEAT), dtype=jnp.float32)
    w0, b0, w1, b1 = init_params(kp, IN_FEAT, HIDDEN, OUT_DIM)

    out = attribute_projector_pallas(x, w0, b0, w1, b1)
    out = jax.block_until_ready(out)

    # Reference check in plain JAX (same math as the PyTorch forward).
    logits = (x @ w0 + b0) @ w1 + b1
    ref = 1.0 / (1.0 + jnp.exp(-logits))
    assert out.shape == (B, OUT_DIM), out.shape
    assert jnp.allclose(out, ref, atol=1e-4, rtol=1e-4), "mismatch vs reference"

    print("KERNEL_OK")
</pallas_src>

<mosaic_0001>
module attributes {stable_mosaic.version = 11 : i64} {
  func.func @_attr_proj_kernel(%arg0: i32, %arg1: memref<8x64xf32, #tpu.memory_space<vmem>>, %arg2: memref<64x128xf32, #tpu.memory_space<vmem>>, %arg3: memref<1x128xf32, #tpu.memory_space<vmem>>, %arg4: memref<8x128xf32, #tpu.memory_space<vmem>>) attributes {dimension_semantics = [#tpu.dimension_semantics<parallel>], iteration_bounds = array<i64: 1>, scalar_prefetch = 0 : i64, scratch_operands = 0 : i64, tpu.core_type = #tpu.core_type<tc>, window_params = [{transform_indices = @transform_0, window_bounds = array<i64: 8, 64>}, {pipeline_mode = #tpu.pipeline_mode<synchronous>, transform_indices = @transform_1, window_bounds = array<i64: 64, 128>}, {pipeline_mode = #tpu.pipeline_mode<synchronous>, transform_indices = @transform_2, window_bounds = array<i64: 1, 128>}, {transform_indices = @transform_3, window_bounds = array<i64: 8, 128>}]} {
    %c0 = arith.constant 0 : index
    %c0_0 = arith.constant 0 : index
    %0 = vector.load %arg1[%c0, %c0_0] : memref<8x64xf32, #tpu.memory_space<vmem>>, vector<8x64xf32>
    %c0_1 = arith.constant 0 : index
    %c0_2 = arith.constant 0 : index
    %1 = vector.load %arg2[%c0_1, %c0_2] : memref<64x128xf32, #tpu.memory_space<vmem>>, vector<64x128xf32>
    %cst = arith.constant dense<0.000000e+00> : vector<8x128xf32>
    %2 = tpu.matmul %0, %1, %cst {dimension_numbers = #tpu.dot_dimension_numbers<[1], [0], [0], [1], [0, 0, 1, 1], [], []>} : vector<8x64xf32>, vector<64x128xf32>, vector<8x128xf32> -> vector<8x128xf32>
    %c0_3 = arith.constant 0 : index
    %c0_4 = arith.constant 0 : index
    %3 = vector.load %arg3[%c0_3, %c0_4] : memref<1x128xf32, #tpu.memory_space<vmem>>, vector<1x128xf32>
    %4 = vector.broadcast %3 : vector<1x128xf32> to vector<8x128xf32>
    %5 = arith.addf %2, %4 : vector<8x128xf32>
    %cst_5 = arith.constant 0.000000e+00 : f32
    %6 = vector.broadcast %cst_5 : f32 to vector<8x128xf32>
    %7 = arith.subf %6, %5 : vector<8x128xf32>
    %8 = math.exp %7 : vector<8x128xf32>
    %cst_6 = arith.constant 1.000000e+00 : f32
    %9 = vector.broadcast %cst_6 : f32 to vector<8x128xf32>
    %10 = arith.addf %9, %8 : vector<8x128xf32>
    %cst_7 = arith.constant 1.000000e+00 : f32
    %11 = vector.broadcast %cst_7 : f32 to vector<8x128xf32>
    %12 = arith.divf %11, %10 : vector<8x128xf32>
    %c0_8 = arith.constant 0 : index
    %c0_9 = arith.constant 0 : index
    %13 = vector.load %arg4[%c0_8, %c0_9] : memref<8x128xf32, #tpu.memory_space<vmem>>, vector<8x128xf32>
    tpu.vector_store %arg4[%c0_8, %c0_9], %12 {strides = array<i32>} : memref<8x128xf32, #tpu.memory_space<vmem>>, vector<8x128xf32>,
    return
  }
  func.func @transform_0(%arg0: i32) -> (i32, i32) {
    %c0_i32 = arith.constant 0 : i32
    %c0_i32_0 = arith.constant 0 : i32
    return %arg0, %c0_i32 : i32, i32
  }
  func.func @transform_1(%arg0: i32) -> (i32, i32) {
    %c0_i32 = arith.constant 0 : i32
    %c0_i32_0 = arith.constant 0 : i32
    %c0_i32_1 = arith.constant 0 : i32
    return %c0_i32, %c0_i32_0 : i32, i32
  }
  func.func @transform_2(%arg0: i32) -> (i32, i32) {
    %c0_i32 = arith.constant 0 : i32
    %c0_i32_0 = arith.constant 0 : i32
    %c0_i32_1 = arith.constant 0 : i32
    return %c0_i32, %c0_i32_0 : i32, i32
  }
  func.func @transform_3(%arg0: i32) -> (i32, i32) {
    %c0_i32 = arith.constant 0 : i32
    %c0_i32_0 = arith.constant 0 : i32
    return %arg0, %c0_i32 : i32, i32
  }
}

</mosaic_0001>

<bundles_post_ra>
// kernel: tpu_custom_call.1
= control target key start
LH: loop header
LB: loop body
LE: loop exit
PB: predicated region body
PF: predicated region fallthrough
CT: control target
= control target key end

     0   :  { %8 = vsyncpa [#allocation3], 0  ;;  %s354_s0 = inlined_call_operand.hbm [shape: f32[8,64], index: 0, kind: input, shape index: {}]   ;;  %s355_s1 = inlined_call_operand.hbm [shape: f32[64,128], index: 1, kind: input, shape index: {}]   ;;  %s356_s2 = inlined_call_operand.vmem [shape: f32[1,128], index: 2, kind: input, shape index: {}]   ;;  %s357_s3 = inlined_call_operand.hbm [shape: f32[8,128], index: 3, kind: output, shape index: {}]  }
   0x1   :  { %9 = vsyncpa [#allocation6], 0 }
   0x2   :  { %10 = vsyncpa [#allocation4], 0  ;;  %s280_s12 = smov [#allocation2]   ;;  %s281_s14 = smov [#allocation5]  }
   0x3   :  { %s17_s13 = sshll.u32 %s280_s12, 4  ;;  %s26_s15 = sshll.u32 %s281_s14, 4  ;;  %s18_s13 = int_to_ptr.vmem [resolvable:$true] %s17_s13  ;;  %s308_s15 = int_to_ptr.vmem [resolvable:$true] %s26_s15 }
   0x4   :  { %s208_s18 = scalar_lea.hbm %s354_s0, 128 }
   0x5   :  { %p209_p0 = scmp.ne.s32.totalorder %s354_s0, %s208_s18  ;;  %p212_p1 = scmp.lt.u32.totalorder %s208_s18, %s354_s0 }
   0x7   :  { %p214_p2 = pnand %p212_p1, %p209_p0 }
   0x9   :  { %217 = shalt.err (!%p214_p2)
}
   0xa   :  { %s218_s23 = scalar_lea.vmem %s18_s13, 128  ;;  %p223_p4 = scmp.lt.s32.totalorder %s18_s13, %s18_s13 }
   0xb   :  { %p219_p3 = scmp.ne.s32.totalorder %s18_s13, %s218_s23  ;;  %p224_p5 = scmp.lt.s32.totalorder %s218_s23, %s218_s23 }
   0xd   :  { %p225_p6 = por %p224_p5, %p223_p4 }
   0xf   :  { %p226_p7 = pnand %p225_p6, %p219_p3 }
  0x11   :  { %229 = shalt.err (!%p226_p7)
}
  0x12   :  { %20 = dma.hbm_to_vmem [thread:$0]  %s354_s0, 128, %s18_s13, [#allocation3]  }
  0x13   :  { %s230_s28 = scalar_lea.hbm %s355_s1, 1024 }
  0x14   :  { %p231_p8 = scmp.ne.s32.totalorder %s355_s1, %s230_s28  ;;  %p234_p9 = scmp.lt.u32.totalorder %s230_s28, %s355_s1 }
  0x16   :  { %p236_p10 = pnand %p234_p9, %p231_p8 }
  0x18   :  { %239 = shalt.err (!%p236_p10)
}
  0x19   :  { %s240_s6 = scalar_lea.vmem %s308_s15, 1024  ;;  %p245_p12 = scmp.lt.s32.totalorder %s308_s15, %s308_s15 }
  0x1a   :  { %p241_p11 = scmp.ne.s32.totalorder %s308_s15, %s240_s6  ;;  %p246_p13 = scmp.lt.s32.totalorder %s240_s6, %s240_s6 }
  0x1c   :  { %p247_p0 = por %p246_p13, %p245_p12 }
  0x1e   :  { %p248_p1 = pnand %p247_p0, %p241_p11 }
  0x20   :  { %251 = shalt.err (!%p248_p1)
}
  0x21   :  { %s282_s0 = smov 128   ;;  %s283_s7 = smov 8  }
  0x22   :  { %32 = dma.hbm_to_vmem [thread:$0]  %s355_s1, 1024, %s308_s15, [#allocation6], %s282_s0, %s282_s0, %s283_s7  }
  0x23   :  { %274 = dma.done.wait [#allocation3], 128  }
  0x24   :  { %275 = vsyncadd [#allocation3], 4294967168 }
  0x25   :  { %276 = dma.done.wait [#allocation6], 1024  }
  0x26   :  { %277 = vsyncadd [#allocation6], 4294966272  ;;  %v284_v0 = vmov 0.0|0.0   ;;  %vm285_vm0 = vmmov 0   ;;  %v286_v1 = vmov 0.0   ;;  %v42_v2 = vld [vmem:[#allocation5] sm:$0xff] }
  0x27   :  { %184 = vmatprep.subr.bf16.mxu0 %v284_v0  ;;  %181 = vmatprep.mubr.msk.f32.mxu0 %vm285_vm0, %v286_v1  ;;  %v43_v3 = vld [vmem:[#allocation5 + $0x8] sm:$0xff]  ;;  %v44_v4 = vld [vmem:[#allocation5 + $0x10] sm:$0xff]  ;;  %v45_v6 = vld [vmem:[#allocation5 + $0x18] sm:$0xff]  ;;  %vm57_vm1 = vcmask 523264   ;;  %s287_s11 = smov [#allocation7]  }
  0x28   :  { %v185_v5 = vpack.c.bf16 %v43_v3, %v42_v2  ;;  %v188_v7 = vpack.c.bf16 %v45_v6, %v44_v4  ;;  %v46_v8 = vld [vmem:[#allocation5 + $0x20] sm:$0xff]  ;;  %v47_v9 = vld [vmem:[#allocation5 + $0x28] sm:$0xff]  ;;  %v48_v11 = vld [vmem:[#allocation5 + $0x30] sm:$0xff]  ;;  %s144_s12 = sshll.u32 %s287_s11, 4  ;;  %s145_s12 = int_to_ptr.vmem [resolvable:$true] %s144_s12 }
  0x29   :  { %v191_v10 = vpack.c.bf16 %v47_v9, %v46_v8  ;;  %v49_v12 = vld [vmem:[#allocation5 + $0x38] sm:$0xff]  ;;  %s252_s13 = scalar_lea.vmem %s145_s12, 128  ;;  %p257_p3 = scmp.lt.s32.totalorder %s145_s12, %s145_s12 }
  0x2a   :  { %186 = vmatpush3.bf16.msra.mxu0 %v185_v5  ;;  %v194_v13 = vpack.c.bf16 %v49_v12, %v48_v11  ;;  %v41_v14 = vld [vmem:[#allocation2] sm:$0xff]  ;;  %p253_p2 = scmp.ne.s32.totalorder %s145_s12, %s252_s13  ;;  %p258_p4 = scmp.lt.s32.totalorder %s252_s13, %s252_s13 }
  0x2b   :  { %187 = vmatprep.subr.bf16.mxu0 %v284_v0  ;;  %v154_v15 = vld [vmem:[%s356_s2] ss:$0 sm:$0xff] }
  0x2c   :  { %p259_p5 = por %p258_p4, %p257_p3 }
  0x2e   :  { %189 = vmatpush3.bf16.msra.mxu0 %v188_v7  ;;  %p260_p6 = pnand %p259_p5, %p253_p2 }
  0x2f   :  { %190 = vmatprep.subr.bf16.mxu0 %v284_v0 }
  0x32   :  { %192 = vmatpush3.bf16.msra.mxu0 %v191_v10 }
  0x33   :  { %193 = vmatprep.subr.bf16.mxu0 %v284_v0 }
  0x36   :  { %195 = vmatpush3.bf16.msra.mxu0 %v194_v13 }
  0x39   :  { %182 = vmatmul.mubr.msk.f32.vlgmr.msra.gmra.mrb[0].mxu0 %vm57_vm1, %v41_v14 }
 0x10c   :  { %v127_v16 = vpop.f32.mrb[0].mxu0 }
 0x10d   :  { %v128_v17 = vadd.f32 %v154_v15, %v127_v16  ;;  %v183_v18 = vpop.f32.mrb[1].mxu0 }
 0x10f   :  { %v131_v19 = vsub.f32 0.0, %v128_v17 }
 0x111   :  { %v132_v20 = vmul.f32 1.442695, %v131_v19 }
 0x113   :  { %204 = vpow2.f32 %v132_v20 }
 0x11d   :  { %v205_v21 = vpop.eup %204 }
 0x11e   :  { %v134_v22 = vadd.f32 1.0, %v205_v21 }
 0x120   :  { %206 = vrcp.f32 %v134_v22 }
 0x12a   :  { %v207_v23 = vpop.eup %206 }
 0x12b   :  { %137 = vst [vmem:[#allocation7] sm:$0xff] %v207_v23 }
 0x12c   :  { %263 = shalt.err (!%p260_p6)
}
 0x12d   :  { %s264_s15 = scalar_lea.hbm %s357_s3, 128 }
 0x12e   :  { %p265_p7 = scmp.ne.s32.totalorder %s357_s3, %s264_s15  ;;  %p268_p8 = scmp.lt.u32.totalorder %s264_s15, %s357_s3 }
 0x130   :  { %p270_p9 = pnand %p268_p8, %p265_p7 }
 0x132   :  { %273 = shalt.err (!%p270_p9)
}
 0x133   :  { %147 = dma.vmem_to_hbm [thread:$0]  %s145_s12, 128, %s357_s3, [#allocation4]  }
 0x134   :  { %278 = dma.done.wait [#allocation4], 128  }
 0x135   :  { %279 = vsyncadd [#allocation4], 4294967168 }
 0x136   :  { %151 = vsyncpa [#allocation3], 1 }
 0x137   :  { %152 = vsyncpa [#allocation6], 1 }
 0x138   :  { %153 = vsyncpa [#allocation4], 1 }

</bundles_post_ra>
